<compile_context>
chip_gen: v5e
topology: v5e:2x2
jax: 0.10.0
libtpu: 0.0.40
codegen_flags: <defaults>
</compile_context>

<pallas_src>
import math

import jax
import jax.numpy as jnp
import numpy as np
from jax.experimental import pallas as pl
from jax.experimental.pallas import tpu as pltpu

_LANE = 128
_BLOCK_BYTE_TARGET = 2 * 1024 * 1024  # per-block budget; 4x (in+out, 2-deep) = 8 MiB


def _copy_kernel(x_ref, o_ref):
    # Identity copy of the current tile: VMEM in -> VMEM out (aliased in HBM).
    o_ref[...] = x_ref[...]


def _resolve_size(size, total):
    """Resolve a single -1 entry in `size` (torch.view semantics)."""
    size = tuple(int(s) for s in size)
    if size.count(-1) > 1:
        raise ValueError("only one dimension can be inferred")
    if -1 in size:
        known = 1
        for s in size:
            if s != -1:
                known *= s
        if known == 0 or total % known != 0:
            raise ValueError(f"shape {size} is invalid for input of size {total}")
        size = tuple(total // known if s == -1 else s for s in size)
    if math.prod(size) != total:
        raise ValueError(f"shape {size} is invalid for input of size {total}")
    return size


def _choose_tiling(total, itemsize):
    """Pick a lane-dense 2D layout (rows, lanes) and a sublane tile.

    Returns (rows, lanes, tile) or None if `total` first needs padding.
    """
    packing = max(1, 4 // itemsize)      # 1 for f32, 2 for bf16/f16, 4 for int8/fp8
    sub_base = 8 * packing               # native packed sublane tile for this dtype
    best = None
    for lanes in (1024, 512, 256, 128):  # prefer the widest lane-dense layout
        if total % lanes:
            continue
        rows = total // lanes
        if rows % sub_base == 0 and rows >= 2 * sub_base:
            best = (rows, lanes, sub_base)   # packed tiles and >= 2 grid steps
            break
        if best is None and rows % 8 == 0:
            best = (rows, lanes, 8)          # acceptable, keep looking for better
    if best is None:
        return None
    rows, lanes, tile = best
    # Grow the tile toward the byte target; keep even division and >= 2 grid
    # steps so "parallel" semantics can shard across both TCs on v7x.
    while (rows % (tile * 2) == 0
           and tile * 2 * lanes * itemsize <= _BLOCK_BYTE_TARGET
           and rows // (tile * 2) >= 2):
        tile *= 2
    return rows, lanes, tile


def pallas_view(tensor: jax.Array, size, materialize: bool = True) -> jax.Array:
    """Equivalent of `tensor.view(size)`.

    materialize=False returns the zero-copy jnp.reshape (true .view semantics);
    materialize=True routes the data through the Pallas identity-copy kernel.
    """
    total = int(np.prod(tensor.shape))
    out_shape = _resolve_size(size, total)

    if not materialize or total == 0:
        # Metadata-only path: no HBM traffic at all.
        return jnp.reshape(tensor, out_shape)

    itemsize = jnp.dtype(tensor.dtype).itemsize
    flat = jnp.reshape(tensor, (-1,))  # glue: C-order flatten (matches torch.view)

    tiling = _choose_tiling(total, itemsize)
    padded_total = total
    if tiling is None:
        # Pad up to a tileable size, copy, then slice the tail back off.
        # Avoids the old single (1, total) block (VMEM blow-up on v7x/v5e and
        # masked vst.msk partial stores on the non-128-multiple lane dim).
        packing = max(1, 4 // itemsize)
        quantum = 8 * packing * _LANE
        padded_total = max(2 * quantum, ((total + quantum - 1) // quantum) * quantum)
        flat = jnp.pad(flat, (0, padded_total - total))
        tiling = _choose_tiling(padded_total, itemsize)
    rows, lanes, tile = tiling

    x2 = flat.reshape(rows, lanes)
    y2 = pl.pallas_call(
        _copy_kernel,
        out_shape=jax.ShapeDtypeStruct((rows, lanes), tensor.dtype),
        grid=(rows // tile,),
        in_specs=[pl.BlockSpec((tile, lanes), lambda i: (i, 0))],
        out_specs=pl.BlockSpec((tile, lanes), lambda i: (i, 0)),
        # Alias the output onto the input: no separate output HBM allocation,
        # and the buffer is donatable under jit.
        input_output_aliases={0: 0},
        compiler_params=pltpu.CompilerParams(
            dimension_semantics=("parallel",)),
        # Pure memory traffic: tell XLA so it can overlap surrounding compute.
        cost_estimate=pl.CostEstimate(
            flops=0, transcendentals=0,
            bytes_accessed=2 * rows * lanes * itemsize),
    )(x2)

    flat_out = y2.reshape(-1)
    if padded_total != total:
        flat_out = flat_out[:total]
    return flat_out.reshape(out_shape)  # glue: final target shape


class View:
    """Mirror of the PyTorch View module (stateless, no parameters)."""

    def __init__(self, size, materialize: bool = True):
        self.size = tuple(size)
        self.materialize = materialize

    def __call__(self, tensor):
        return pallas_view(tensor, self.size, materialize=self.materialize)


if __name__ == "__main__":
    key = jax.random.PRNGKey(0)

    # Case 1: ZSKT-generator usage -- flat linear output (N, C*H*W) viewed to
    # NCHW. Small shapes: N=2, C=128, H=W=8.
    N, C, H, W = 2, 128, 8, 8
    x = jax.random.normal(key, (N, C * H * W), dtype=jnp.float32)
    ref = jnp.reshape(x, (N, C, H, W))          # C-order reshape == torch .view()
    y = View((-1, C, H, W))(x)
    y = jax.block_until_ready(y)
    assert y.shape == (N, C, H, W), y.shape
    assert y.dtype == x.dtype
    np.testing.assert_array_equal(np.asarray(y), np.asarray(ref))

    # Case 2: ragged (element count not a multiple of 128), bf16 -- exercises
    # the padded tiled path and the dtype-aware (16-row) sublane tile.
    x_r = jax.random.normal(jax.random.PRNGKey(1), (3, 7, 5), dtype=jnp.bfloat16)
    ref_r = jnp.reshape(x_r, (7, -1))
    y_r = View((7, -1))(x_r)
    y_r = jax.block_until_ready(y_r)
    assert y_r.shape == (7, 15), y_r.shape
    assert y_r.dtype == x_r.dtype
    np.testing.assert_array_equal(np.asarray(y_r), np.asarray(ref_r))

    print("KERNEL_OK")
</pallas_src>

<mosaic_0001>
module attributes {stable_mosaic.version = 11 : i64} {
  func.func @_copy_kernel(%arg0: i32, %arg1: memref<8x1024xf32, #tpu.memory_space<vmem>>, %arg2: memref<8x1024xf32, #tpu.memory_space<vmem>>) attributes {dimension_semantics = [#tpu.dimension_semantics<parallel>], iteration_bounds = array<i64: 2>, scalar_prefetch = 0 : i64, scratch_operands = 0 : i64, tpu.core_type = #tpu.core_type<tc>, window_params = [{transform_indices = @transform_0, window_bounds = array<i64: 8, 1024>}, {transform_indices = @transform_1, window_bounds = array<i64: 8, 1024>}]} {
    %c0 = arith.constant 0 : index
    %c0_0 = arith.constant 0 : index
    %0 = vector.load %arg1[%c0, %c0_0] : memref<8x1024xf32, #tpu.memory_space<vmem>>, vector<8x1024xf32>
    %c0_1 = arith.constant 0 : index
    %c0_2 = arith.constant 0 : index
    %1 = vector.load %arg2[%c0_1, %c0_2] : memref<8x1024xf32, #tpu.memory_space<vmem>>, vector<8x1024xf32>
    tpu.vector_store %arg2[%c0_1, %c0_2], %0 {strides = array<i32>} : memref<8x1024xf32, #tpu.memory_space<vmem>>, vector<8x1024xf32>,
    return
  }
  func.func @transform_0(%arg0: i32) -> (i32, i32) {
    %c0_i32 = arith.constant 0 : i32
    %c0_i32_0 = arith.constant 0 : i32
    return %arg0, %c0_i32 : i32, i32
  }
  func.func @transform_1(%arg0: i32) -> (i32, i32) {
    %c0_i32 = arith.constant 0 : i32
    %c0_i32_0 = arith.constant 0 : i32
    return %arg0, %c0_i32 : i32, i32
  }
}

</mosaic_0001>

<bundles_post_ra>
// kernel: tpu_custom_call.1
= control target key start
LH: loop header
LB: loop body
LE: loop exit
PB: predicated region body
PF: predicated region fallthrough
CT: control target
= control target key end

     0   :  { %6 = vsyncpa [#allocation3], 0  ;;  %s535_s0 = inlined_call_operand.hbm [shape: f32[16,1024], index: 0, kind: input, shape index: {}, may-alias: {0,1}]   ;;  %s536_s1 = inlined_call_operand.hbm [shape: f32[16,1024], index: 1, kind: output, shape index: {}, may-alias: {0,1}]  }
   0x1   :  { %8 = vsyncpa [#allocation3 + $0x1], 0 }
   0x2   :  { %9 = vsyncpa [#allocation4], 0 }
   0x3   :  { %11 = vsyncpa [#allocation4 + $0x1], 0  ;;  %s408_s6 = smov 0   ;;  %s410_s7 = smov 0  }
   0x4   :  { %s412_s8 = smov 0   ;;  %s414_s9 = smov 0  }
   0x5 LB: > { %s429_s10 = sadd.s32 4294967295, %s396_s9   ;;  %s238_s11 = sadd.s32 4294967294, %s396_s9   ;;  %s396_s9 = sphi %s414_s9, %s546_s9   ;;  %s392_s8 = sphi %s412_s8, %s545_s8   ;;  %s388_s7 = sphi %s410_s7, %s544_s7   ;;  %s384_s6 = sphi %s408_s6, %s543_s6  }
   0x6   : > { %s433_s12 = sadd.s32 1, %s396_s9   ;;  %s24_s13 = sadd.s32 1, %s392_s8 }
   0x7   : > { %s21_s14 = ssub.s32 %s396_s9, %s433_s12  ;;  %p31_p0 = scmp.ne.s32.totalorder %s392_s8, %s388_s7 }
   0x8   : > { %p22_p1 = scmp.eq.s32.totalorder %s21_s14, 0  ;;  %p32_p2 = scmp.eq.s32.totalorder %s396_s9, 0 }
   0x9   : > { %p37_p3 = scmp.ne.s32.totalorder %s388_s7, %s384_s6  ;;  %p38_p4 = scmp.eq.s32.totalorder %s429_s10, 0 }
   0xa   : > { %s445_s15 = scalar_select %p22_p1, %s392_s8, %s24_s13  }
   0xb   : > { %p447_p5 = por %p32_p2, %p31_p0  ;;  %p451_p6 = por %p38_p4, %p37_p3 }
   0xc   : > { %p61_p7 = scmp.eq.s32.totalorder %s429_s10, 1  ;;  %p67_p8 = scmp.eq.s32.totalorder %s238_s11, 1 }
   0xd   : > { %p266_p10 = scmp.lt.s32.totalorder %s396_s9, 2  ;;  %s87_s20 = sand.u32 1, %s392_s8  }
   0xe   : > { %p458_p11 = por %p61_p7, %p31_p0  ;;  %p462_p12 = por %p67_p8, %p37_p3 }
   0xf   : > { %s252_s21 = sshll.u32 %s396_s9, 6  ;;  %s241_s22 = sshll.u32 %s87_s20, 6 }
  0x10   : > { %s96_s25 = scalar_lea.hbm %s535_s0, %s252_s21  ;;  %s91_s27 = scalar_lea.vmem [#allocation2], %s241_s22 }
  0x11   : > { %s98_s26 = sshll.u32 %s96_s25, 4  ;;  %s100_s28 = sshll.u32 %s91_s27, 4  ;;  %s99_s26 = int_to_ptr.hbm [resolvable:$true] %s98_s26  ;;  %s101_s28 = int_to_ptr.vmem [resolvable:$true] %s100_s28 }
  0x12   : > { %p473_p13 = pnand %p266_p10, %p447_p5  ;;  %p244_p0 = scmp.ge.s32.totalorder %s396_s9, 1 }
  0x13   : > { %p105_p1 = scmp.lt.s32.totalorder %s396_s9, 3  ;;  %s88_s30 = scalar_lea.sflag [#allocation3], %s87_s20 }
  0x14   : > { %s300_s2 = sshra.s32 %s99_s26, 4  ;;  %p304_p3 = pneg %p473_p13  ;;  %s301_s2 = int_to_ptr.hbm [resolvable:$true] %s300_s2 }
  0x15   : > { %s302_s3 = scalar_lea.hbm %s301_s2, 64  ;;  %s307_s11 = scalar_lea.hbm %s535_s0, 128 }
  0x16   : > { %p303_p2 = scmp.ne.s32.totalorder %s301_s2, %s302_s3  ;;  %p308_p5 = scmp.lt.s32.totalorder %s301_s2, %s535_s0 }
  0x17   : > { %p309_p8 = scmp.lt.s32.totalorder %s307_s11, %s302_s3 }
  0x18   : > { %p305_p4 = pnand %p304_p3, %p303_p2 }
  0x19   : > { %p310_p10 = por %p309_p8, %p308_p5 }
  0x1a   : > { %p306_p7 = pneg %p305_p4 }
  0x1c   : > { %p311_p9 = pnand %p310_p10, %p306_p7 }
  0x1e   : > { %314 = shalt.err (!%p311_p9)
}
  0x1f   : > { %261 = dma.hbm_to_vmem [thread:$0]  (!%p473_p13), %s99_s26, 1024, %s101_s28, %s88_s30  }
  0x20   : > { %p106_p2 = pnand %p244_p0, %p105_p1 }
  0x21   : > { %s494_s16 = sand.u32 (!%p106_p2), 1, %s388_s7  }
  0x22   : > { %109 = sbr.rel (%p106_p2) target bundleno = 55 (0x37), region = 24  ;;  %s245_s20 = sshll.u32 (!%p106_p2), %s494_s16, 6 }
  0x23   : > { %s112_s21 = scalar_lea.sflag (!%p106_p2), [#allocation3], %s494_s16  ;;  %s115_s22 = scalar_lea.vmem (!%p106_p2), [#allocation2], %s245_s20 }
  0x27   : > { %375 = dma.done.wait (%p451_p6), %s112_s21, 1024  }
  0x28   : > { %377 = vsyncadd (%p451_p6), %s112_s21, 4294966272  ;;  %s253_s23 = sshll.u32 %s429_s10, 6  ;;  %v135_v0 = vld [vmem:[%s115_s22] sm:$0xff]  ;;  %v136_v1 = vld [vmem:[%s115_s22 + $0x8] sm:$0xff]  ;;  %s134_s27 = scalar_lea.vmem [#allocation5], %s245_s20 }
  0x29   : > { %v137_v2 = vld [vmem:[%s115_s22 + $0x10] sm:$0xff]  ;;  %s163_s26 = scalar_lea.hbm %s536_s1, %s253_s23  ;;  %143 = vst [vmem:[%s134_s27] sm:$0xff] %v135_v0  ;;  %v138_v3 = vld [vmem:[%s115_s22 + $0x18] sm:$0xff]  ;;  %v139_v4 = vld [vmem:[%s115_s22 + $0x20] sm:$0xff]  ;;  %s165_s28 = sshll.u32 %s134_s27, 4  ;;  %s166_s28 = int_to_ptr.vmem [resolvable:$true] %s165_s28 }
  0x2a   : > { %144 = vst [vmem:[%s134_s27 + $0x8] sm:$0xff] %v136_v1  ;;  %v140_v5 = vld [vmem:[%s115_s22 + $0x28] sm:$0xff]  ;;  %s167_s17 = sshll.u32 %s163_s26, 4  ;;  %v141_v6 = vld [vmem:[%s115_s22 + $0x30] sm:$0xff]  ;;  %v142_v7 = vld [vmem:[%s115_s22 + $0x38] sm:$0xff]  ;;  %s152_s10 = scalar_lea.sflag [#allocation4], %s494_s16  ;;  %s168_s17 = int_to_ptr.hbm [resolvable:$true] %s167_s17 }
  0x2b   : > { %145 = vst [vmem:[%s134_s27 + $0x10] sm:$0xff] %v137_v2  ;;  %s344_s29 = sshra.s32 %s168_s17, 4  ;;  %s350_s4 = scalar_lea.hbm %s536_s1, 128  ;;  %s345_s29 = int_to_ptr.hbm [resolvable:$true] %s344_s29 }
  0x2c   : > { %146 = vst [vmem:[%s134_s27 + $0x18] sm:$0xff] %v138_v3  ;;  %s346_s30 = scalar_lea.hbm %s345_s29, 64  ;;  %p351_p0 = scmp.lt.s32.totalorder %s345_s29, %s536_s1 }
  0x2d   : > { %147 = vst [vmem:[%s134_s27 + $0x20] sm:$0xff] %v139_v4  ;;  %p347_p6 = scmp.ne.s32.totalorder %s345_s29, %s346_s30  ;;  %p352_p1 = scmp.lt.s32.totalorder %s350_s4, %s346_s30 }
  0x2e   : > { %148 = vst [vmem:[%s134_s27 + $0x28] sm:$0xff] %v140_v5 }
  0x2f   : > { %149 = vst [vmem:[%s134_s27 + $0x30] sm:$0xff] %v141_v6  ;;  %p348_p9 = pnand %p347_p6, %p458_p11  ;;  %p353_p3 = por %p352_p1, %p351_p0 }
  0x30   : > { %150 = vst [vmem:[%s134_s27 + $0x38] sm:$0xff] %v142_v7 }
  0x31   : > { %p349_p13 = pneg %p348_p9 }
  0x33   : > { %p354_p4 = pnand %p353_p3, %p349_p13 }
  0x35   : > { %357 = shalt.err (!%p354_p4)
}
  0x36   : > { %256 = dma.vmem_to_hbm [thread:$0]  (%p458_p11), %s166_s28, 1024, %s168_s17, %s152_s10  }
  0x37 PF: > { %s179_s13 = sand.u32 1, %s384_s6   ;;  %p542_p7 = scmp.ge.s32.totalorder %s396_s9, 2 }
  0x38   : > { %s180_s14 = scalar_lea.sflag [#allocation4], %s179_s13 }
  0x39   : > { %p263_p5 = pnand %p542_p7, %p462_p12 }
  0x3b   : > { %p264_p8 = pneg %p263_p5 }
  0x3d   : > { %379 = dma.done.wait (%p264_p8), %s180_s14, 1024  }
  0x3e   : > { %381 = vsyncadd (%p264_p8), %s180_s14, 4294966272  ;;  %p14_p10 = scmp.ge.s32.totalorder %s433_s12, 4   ;;  %s543_s6 = smov %s388_s7 }
  0x3f   : > { %s544_s7 = smov %s392_s8  ;;  %s545_s8 = smov %s445_s15 }
  0x40   : > { %s546_s9 = smov %s433_s12  ;;  %16 = sbr.rel (!%p14_p10) target bundleno = 5 (0x5), region = 69 }
  0x45   :  { %186 = vsyncpa [#allocation3], 1 }
  0x46   :  { %188 = vsyncpa [#allocation3 + $0x1], 1 }
  0x47   :  { %189 = vsyncpa [#allocation4], 1 }
  0x48   :  { %191 = vsyncpa [#allocation4 + $0x1], 1 }

</bundles_post_ra>
